<compile_context>
chip_gen: v7x
topology: tpu7x:2x2x1
jax: 0.10.0
libtpu: 0.0.40
codegen_flags: <defaults>
</compile_context>

<pallas_src>
import functools

import jax
import jax.numpy as jnp
from jax import lax
from jax.experimental import pallas as pl
from jax.experimental.pallas import tpu as pltpu


def _proj_norm_kernel(w_ref, b_ref, x_ref, o_ref, *, chunk, compute_dtype):
    # w_ref: (C_out, C_in)   bf16  (constant index map -> VMEM-resident across the grid)
    # b_ref: (C_out, 1)      f32
    # x_ref: (NB, C_in, TS)  input dtype (f32); cast to bf16 per chunk in-kernel
    # o_ref: (NB, C_out, TS) out_dtype (default bf16)
    nb, _, ts = x_ref.shape
    n_chunks = ts // chunk
    w = w_ref[...]        # hoisted out of the loops
    b = b_ref[...]

    for i in range(nb):                      # small static batch sub-block (<= 8)
        for j in range(n_chunks):            # static lane chunks -> static ref slices
            c0 = j * chunk
            x = x_ref[i, :, c0:c0 + chunk].astype(compute_dtype)     # (C_in, chunk)
            y = jnp.dot(w, x, preferred_element_type=jnp.float32)    # MXU, f32 acc
            # TODO(synk): on v7x, fold bias into the MXU (K+1 ones row) to trim the VPU.
            y = y + b                                                 # (C_out, chunk)
            sumsq = jnp.sum(y * y, axis=0, keepdims=True)             # (1, chunk)
            inv = lax.rsqrt(jnp.maximum(sumsq, 1e-24))                # == 1/max(||y||,1e-12)
            o_ref[i, :, c0:c0 + chunk] = (y * inv).astype(o_ref.dtype)


def _largest_tile(total, cap):
    """Largest multiple of 128 that divides `total` and is <= cap (>= 128)."""
    best, t = 128, 128
    while t <= min(total, cap):
        if total % t == 0:
            best = t
        t += 128
    return best


def _spatial_cap(c_in, c_out, in_bytes, out_bytes, vmem_budget_bytes, hard_cap=8192):
    # Double-buffered I/O per spatial lane + f32 intermediates (y, y*y) per chunk.
    per_lane = 2 * (c_in * in_bytes + c_out * out_bytes) + 2 * c_out * 4
    cap = max(128, (vmem_budget_bytes // per_lane) // 128 * 128)
    return min(cap, hard_cap)


def _batch_fold(n, ts, cap_lanes, target_lanes=2048, max_nb=8):
    nb = 1
    for d in range(1, min(n, max_nb) + 1):
        if n % d == 0 and d * ts <= cap_lanes:
            nb = d
            if d * ts >= target_lanes:
                break
    return nb


def projection_head_forward(x_nchw, weight, bias, *,
                            out_dtype=jnp.bfloat16,
                            compute_dtype=jnp.bfloat16,
                            vmem_budget_bytes=24 * 1024 * 1024):
    """x_nchw: (N, C_in, H, W); weight: (C_out, C_in) (1x1 conv weight squeezed);
    bias: (C_out,). Returns channel-wise L2-normalized (N, C_out, H, W) in out_dtype."""
    n, c_in, h, w = x_nchw.shape
    c_out = weight.shape[0]
    spatial = h * w
    spatial_p = pl.cdiv(spatial, 128) * 128          # lane-dense multiple of 128

    in_bytes = jnp.dtype(x_nchw.dtype).itemsize
    out_bytes = jnp.dtype(out_dtype).itemsize
    cap = _spatial_cap(c_in, c_out, in_bytes, out_bytes, vmem_budget_bytes)
    ts = _largest_tile(spatial_p, cap)               # spatial tile (multiple of 128)
    nb = _batch_fold(n, ts, cap) if ts == spatial_p else 1
    chunk = _largest_tile(ts, 512)                   # in-kernel lane chunk

    x3 = x_nchw.reshape(n, c_in, spatial)            # free reshape; NO wrapper cast
    if spatial_p != spatial:
        x3 = jnp.pad(x3, ((0, 0), (0, 0), (0, spatial_p - spatial)))
    w_mat = weight.astype(compute_dtype)             # (C_out, C_in), tiny
    b_col = bias.reshape(c_out, 1).astype(jnp.float32)

    grid = (n // nb, spatial_p // ts)
    kernel = functools.partial(_proj_norm_kernel, chunk=chunk,
                               compute_dtype=compute_dtype)

    out3 = pl.pallas_call(
        kernel,
        out_shape=jax.ShapeDtypeStruct((n, c_out, spatial_p), out_dtype),
        grid_spec=pltpu.PrefetchScalarGridSpec(
            num_scalar_prefetch=0,
            grid=grid,
            in_specs=[
                # Weight / bias: constant index maps -> stay VMEM-resident.
                pl.BlockSpec((c_out, c_in), lambda b, s: (0, 0)),
                pl.BlockSpec((c_out, 1), lambda b, s: (0, 0)),
                # X: (batch sub-block, C_in, spatial-tile); lane axis = spatial.
                pl.BlockSpec((nb, c_in, ts), lambda b, s: (b, 0, s)),
            ],
            out_specs=pl.BlockSpec((nb, c_out, ts), lambda b, s: (b, 0, s)),
        ),
        compiler_params=pltpu.CompilerParams(
            dimension_semantics=("parallel", "parallel"),
            vmem_limit_bytes=48 * 1024 * 1024),
    )(w_mat, b_col, x3)

    if spatial_p != spatial:
        out3 = out3[:, :, :spatial]
    return out3.reshape(n, c_out, h, w)


def _reference(x_nchw, weight, bias, compute_dtype=jnp.bfloat16):
    # Conv2d(1x1) + F.normalize(p=2, dim=1), same bf16 MXU operands / f32 accumulation
    # as the kernel so the comparison is apples-to-apples.
    y = jnp.einsum(
        "nchw,oc->nohw",
        x_nchw.astype(compute_dtype), weight.astype(compute_dtype),
        preferred_element_type=jnp.float32)
    y = y + bias[None, :, None, None].astype(jnp.float32)
    norm = jnp.sqrt(jnp.sum(y * y, axis=1, keepdims=True))
    return y / jnp.maximum(norm, 1e-12)


if __name__ == "__main__":
    # Small shapes consistent with the module: dim_in=32, proj_dim=128.
    N, C_IN, C_OUT = 2, 32, 128

    key = jax.random.PRNGKey(0)
    kx, kw, kb, kx2 = jax.random.split(key, 4)
    weight = jax.random.normal(kw, (C_OUT, C_IN), dtype=jnp.float32) * 0.05
    bias = jax.random.normal(kb, (C_OUT,), dtype=jnp.float32) * 0.01

    # 1) Aligned spatial (16x16), default bf16 output (bandwidth-optimal path).
    x = jax.random.normal(kx, (N, C_IN, 16, 16), dtype=jnp.float32)
    out = jax.block_until_ready(projection_head_forward(x, weight, bias))
    ref = _reference(x, weight, bias)
    assert out.shape == (N, C_OUT, 16, 16) and out.dtype == jnp.bfloat16
    err = float(jnp.max(jnp.abs(out.astype(jnp.float32) - ref)))
    assert err < 2e-2, err

    # 2) Same inputs, f32 output path (tight numeric check of the math).
    out32 = jax.block_until_ready(
        projection_head_forward(x, weight, bias, out_dtype=jnp.float32))
    err32 = float(jnp.max(jnp.abs(out32 - ref)))
    assert err32 < 1e-3, err32

    # 3) Ragged spatial (9x9 -> padded to 128 lanes in the wrapper, sliced back).
    x2 = jax.random.normal(kx2, (N, C_IN, 9, 9), dtype=jnp.float32)
    out2 = jax.block_until_ready(projection_head_forward(x2, weight, bias))
    ref2 = _reference(x2, weight, bias)
    assert out2.shape == (N, C_OUT, 9, 9)
    err2 = float(jnp.max(jnp.abs(out2.astype(jnp.float32) - ref2)))
    assert err2 < 2e-2, err2

    print("KERNEL_OK")
</pallas_src>

<mosaic_0001>
module attributes {stable_mosaic.version = 11 : i64} {
  func.func @_proj_norm_kernel(%arg0: i32, %arg1: i32, %arg2: memref<128x32xbf16, #tpu.memory_space<vmem>>, %arg3: memref<128x1xf32, #tpu.memory_space<vmem>>, %arg4: memref<2x32x256xf32, #tpu.memory_space<vmem>>, %arg5: memref<2x128x256xbf16, #tpu.memory_space<vmem>>) attributes {dimension_semantics = [#tpu.dimension_semantics<parallel>, #tpu.dimension_semantics<parallel>], iteration_bounds = array<i64: 1, 1>, scalar_prefetch = 0 : i64, scratch_operands = 0 : i64, tpu.core_type = #tpu.core_type<tc>, window_params = [{pipeline_mode = #tpu.pipeline_mode<synchronous>, transform_indices = @transform_0, window_bounds = array<i64: 128, 32>}, {pipeline_mode = #tpu.pipeline_mode<synchronous>, transform_indices = @transform_1, window_bounds = array<i64: 128, 1>}, {transform_indices = @transform_2, window_bounds = array<i64: 2, 32, 256>}, {transform_indices = @transform_3, window_bounds = array<i64: 2, 128, 256>}]} {
    %c0 = arith.constant 0 : index
    %c0_0 = arith.constant 0 : index
    %0 = vector.load %arg2[%c0, %c0_0] : memref<128x32xbf16, #tpu.memory_space<vmem>>, vector<128x32xbf16>
    %c0_1 = arith.constant 0 : index
    %c0_2 = arith.constant 0 : index
    %1 = vector.load %arg3[%c0_1, %c0_2] : memref<128x1xf32, #tpu.memory_space<vmem>>, vector<128x1xf32>
    %c0_3 = arith.constant 0 : index
    %c0_4 = arith.constant 0 : index
    %c0_5 = arith.constant 0 : index
    %2 = vector.load %arg4[%c0_3, %c0_4, %c0_5] : memref<2x32x256xf32, #tpu.memory_space<vmem>>, vector<1x32x256xf32>
    %3 = vector.shape_cast %2 : vector<1x32x256xf32> to vector<32x256xf32>
    %4 = arith.truncf %3 : vector<32x256xf32> to vector<32x256xbf16>
    %cst = arith.constant dense<0.000000e+00> : vector<128x256xf32>
    %5 = tpu.matmul %0, %4, %cst {dimension_numbers = #tpu.dot_dimension_numbers<[1], [0], [0], [1], [0, 0, 1, 1], [], []>} : vector<128x32xbf16>, vector<32x256xbf16>, vector<128x256xf32> -> vector<128x256xf32>
    %6 = vector.broadcast %1 : vector<128x1xf32> to vector<128x256xf32>
    %7 = arith.addf %5, %6 : vector<128x256xf32>
    %8 = arith.mulf %7, %7 : vector<128x256xf32>
    %cst_6 = arith.constant dense<0.000000e+00> : vector<256xf32>
    %9 = vector.multi_reduction <add>, %8, %cst_6 [0] : vector<128x256xf32> to vector<256xf32>
    %10 = vector.shape_cast %9 : vector<256xf32> to vector<1x256xf32>
    %cst_7 = arith.constant 1.000000e-24 : f32
    %11 = vector.broadcast %cst_7 : f32 to vector<1x256xf32>
    %12 = arith.maximumf %10, %11 : vector<1x256xf32>
    %13 = math.rsqrt %12 : vector<1x256xf32>
    %14 = vector.broadcast %13 : vector<1x256xf32> to vector<128x256xf32>
    %15 = arith.mulf %7, %14 : vector<128x256xf32>
    %16 = arith.truncf %15 : vector<128x256xf32> to vector<128x256xbf16>
    %c0_8 = arith.constant 0 : index
    %c0_9 = arith.constant 0 : index
    %c0_10 = arith.constant 0 : index
    %17 = vector.load %arg5[%c0_8, %c0_9, %c0_10] : memref<2x128x256xbf16, #tpu.memory_space<vmem>>, vector<1x128x256xbf16>
    %18 = vector.shape_cast %17 : vector<1x128x256xbf16> to vector<128x256xbf16>
    %19 = vector.shape_cast %16 : vector<128x256xbf16> to vector<1x128x256xbf16>
    tpu.vector_store %arg5[%c0_8, %c0_9, %c0_10], %19 {strides = array<i32>} : memref<2x128x256xbf16, #tpu.memory_space<vmem>>, vector<1x128x256xbf16>,
    %c1 = arith.constant 1 : index
    %c0_11 = arith.constant 0 : index
    %c0_12 = arith.constant 0 : index
    %20 = vector.load %arg4[%c1, %c0_11, %c0_12] : memref<2x32x256xf32, #tpu.memory_space<vmem>>, vector<1x32x256xf32>
    %21 = vector.shape_cast %20 : vector<1x32x256xf32> to vector<32x256xf32>
    %22 = arith.truncf %21 : vector<32x256xf32> to vector<32x256xbf16>
    %cst_13 = arith.constant dense<0.000000e+00> : vector<128x256xf32>
    %23 = tpu.matmul %0, %22, %cst_13 {dimension_numbers = #tpu.dot_dimension_numbers<[1], [0], [0], [1], [0, 0, 1, 1], [], []>} : vector<128x32xbf16>, vector<32x256xbf16>, vector<128x256xf32> -> vector<128x256xf32>
    %24 = vector.broadcast %1 : vector<128x1xf32> to vector<128x256xf32>
    %25 = arith.addf %23, %24 : vector<128x256xf32>
    %26 = arith.mulf %25, %25 : vector<128x256xf32>
    %cst_14 = arith.constant dense<0.000000e+00> : vector<256xf32>
    %27 = vector.multi_reduction <add>, %26, %cst_14 [0] : vector<128x256xf32> to vector<256xf32>
    %28 = vector.shape_cast %27 : vector<256xf32> to vector<1x256xf32>
    %cst_15 = arith.constant 1.000000e-24 : f32
    %29 = vector.broadcast %cst_15 : f32 to vector<1x256xf32>
    %30 = arith.maximumf %28, %29 : vector<1x256xf32>
    %31 = math.rsqrt %30 : vector<1x256xf32>
    %32 = vector.broadcast %31 : vector<1x256xf32> to vector<128x256xf32>
    %33 = arith.mulf %25, %32 : vector<128x256xf32>
    %34 = arith.truncf %33 : vector<128x256xf32> to vector<128x256xbf16>
    %c1_16 = arith.constant 1 : index
    %c0_17 = arith.constant 0 : index
    %c0_18 = arith.constant 0 : index
    %35 = vector.load %arg5[%c1_16, %c0_17, %c0_18] : memref<2x128x256xbf16, #tpu.memory_space<vmem>>, vector<1x128x256xbf16>
    %36 = vector.shape_cast %35 : vector<1x128x256xbf16> to vector<128x256xbf16>
    %37 = vector.shape_cast %34 : vector<128x256xbf16> to vector<1x128x256xbf16>
    tpu.vector_store %arg5[%c1_16, %c0_17, %c0_18], %37 {strides = array<i32>} : memref<2x128x256xbf16, #tpu.memory_space<vmem>>, vector<1x128x256xbf16>,
    return
  }
  func.func @transform_0(%arg0: i32, %arg1: i32) -> (i32, i32) {
    %c0_i32 = arith.constant 0 : i32
    %c0_i32_0 = arith.constant 0 : i32
    %c0_i32_1 = arith.constant 0 : i32
    return %c0_i32, %c0_i32_0 : i32, i32
  }
  func.func @transform_1(%arg0: i32, %arg1: i32) -> (i32, i32) {
    %c0_i32 = arith.constant 0 : i32
    %c0_i32_0 = arith.constant 0 : i32
    %c0_i32_1 = arith.constant 0 : i32
    return %c0_i32, %c0_i32_0 : i32, i32
  }
  func.func @transform_2(%arg0: i32, %arg1: i32) -> (i32, i32, i32) {
    %c0_i32 = arith.constant 0 : i32
    %c0_i32_0 = arith.constant 0 : i32
    return %arg0, %c0_i32, %arg1 : i32, i32, i32
  }
  func.func @transform_3(%arg0: i32, %arg1: i32) -> (i32, i32, i32) {
    %c0_i32 = arith.constant 0 : i32
    %c0_i32_0 = arith.constant 0 : i32
    return %arg0, %c0_i32, %arg1 : i32, i32, i32
  }
}

</mosaic_0001>

<bundles_post_ra>
// kernel: tpu_custom_call.1
= control target key start
LH: loop header
LB: loop body
LE: loop exit
PB: predicated region body
PF: predicated region fallthrough
CT: control target
= control target key end

     0   :  { %v1047_v7 = vmov 0   ;;  %vm180_vm0 = vcmask 261120   ;;  %s1580_s0 = inlined_call_operand.vmem [shape: bf16[128,32], index: 0, kind: input, shape index: {}]   ;;  %s1581_s1 = inlined_call_operand.vmem [shape: f32[128,1], index: 1, kind: input, shape index: {}]   ;;  %s1582_s2 = inlined_call_operand.vmem [shape: f32[2,32,256], index: 2, kind: input, shape index: {}]   ;;  %s1583_s3 = inlined_call_operand.hbm [shape: bf16[2,128,256], index: 3, kind: output, shape index: {}]  }
   0x1   :  { %v49_v0 = vld [vmem:[%s1582_s2 + $0x8] sm:$0xff]  ;;  %v51_v1 = vld [vmem:[%s1582_s2 + $0x18] sm:$0xff]  ;;  %v48_v5 = vld [vmem:[%s1582_s2] sm:$0xff]  ;;  %237 = vmatprep.mubr.bf16.mxu0 %v1047_v7  ;;  %585 = vmatprep.mubr.bf16.mxu1 %v1047_v7 }
   0x2   :  { %v938_v2 = vld [vmem:[%s1582_s2 + $0x48] sm:$0xff]  ;;  %v57_v3 = vpack.c.bf16 %v51_v1, %v49_v0  ;;  %v940_v4 = vld [vmem:[%s1582_s2 + $0x58] sm:$0xff]  ;;  %v50_v6 = vld [vmem:[%s1582_s2 + $0x10] sm:$0xff]  ;;  %1005 = vset.pattern.permute.xlu0 %v1047_v7  ;;  %1006 = vset.pattern.permute.xlu1 %v1047_v7 }
   0x3   :  { %v550_v8 = vpack.c.bf16 %v940_v4, %v938_v2  ;;  %v56_v9 = vpack.c.bf16 %v50_v6, %v48_v5  ;;  %v937_v10 = vld [vmem:[%s1582_s2 + $0x40] sm:$0xff]  ;;  %v939_v11 = vld [vmem:[%s1582_s2 + $0x50] sm:$0xff]  ;;  %v53_v12 = vld [vmem:[%s1582_s2 + $0x28] sm:$0xff] }
   0x4   :  { %205 = vmatprep.subr.bf16.mxu0 %v57_v3  ;;  %v549_v13 = vpack.c.bf16 %v939_v11, %v937_v10  ;;  %v55_v14 = vld [vmem:[%s1582_s2 + $0x38] sm:$0xff]  ;;  %v942_v15 = vld [vmem:[%s1582_s2 + $0x68] sm:$0xff]  ;;  %v52_v19 = vld [vmem:[%s1582_s2 + $0x20] sm:$0xff] }
   0x5   :  { %v944_v16 = vld [vmem:[%s1582_s2 + $0x78] sm:$0xff]  ;;  %553 = vmatprep.subr.bf16.mxu1 %v550_v8  ;;  %206 = vmatpush1.bf16.msra.mxu0 %v56_v9  ;;  %v59_v17 = vpack.c.bf16 %v55_v14, %v53_v12  ;;  %v54_v20 = vld [vmem:[%s1582_s2 + $0x30] sm:$0xff]  ;;  %v941_v21 = vld [vmem:[%s1582_s2 + $0x60] sm:$0xff] }
   0x6   :  { %v552_v18 = vpack.c.bf16 %v944_v16, %v942_v15  ;;  %554 = vmatpush1.bf16.msra.mxu1 %v549_v13  ;;  %v58_v22 = vpack.c.bf16 %v54_v20, %v52_v19  ;;  %v943_v23 = vld [vmem:[%s1582_s2 + $0x70] sm:$0xff]  ;;  %v1007_v25 = vld [vmem:[%s1580_s0] sm:$0xff]   ;;  %v1008_v28 = vld [vmem:[%s1580_s0 + $0x8] sm:$0xff]  }
   0x7   :  { %207 = vmatprep.subr.bf16.mxu0 %v59_v17  ;;  %v551_v24 = vpack.c.bf16 %v943_v23, %v941_v21  ;;  %v32_v26 = vld [vmem:[%s1581_s1] sm:$0xff]  ;;  %v34_v27 = vld [vmem:[%s1581_s1 + $0x10] sm:$0xff]  ;;  %v33_v29 = vld [vmem:[%s1581_s1 + $0x8] sm:$0xff] }
   0x8   :  { %555 = vmatprep.subr.bf16.mxu1 %v552_v18  ;;  %62 = vperm.xlu0 %1005, %v32_v26   ;;  %v35_v30 = vld [vmem:[%s1581_s1 + $0x18] sm:$0xff] }
   0x9   :  { %208 = vmatpush1.bf16.msra.mxu0 %v58_v22  ;;  %72 = vperm.xlu1 %1006, %v34_v27  }
   0xa   :  { %556 = vmatpush1.bf16.msra.mxu1 %v551_v24 }
   0xc   :  { %913 = vmatmul.mubr.msk.bf16.vlgmr.msra.gmra.mrb[0].mxu0 %vm180_vm0, %v1007_v25  ;;  %67 = vperm.xlu0 %1005, %v33_v29  }
   0xd   :  { %945 = vmatmul.mubr.msk.bf16.vlgmr.msra.gmra.mrb[0].mxu1 %vm180_vm0, %v1007_v25  ;;  %247 = vmatprep.mubr.bf16.mxu0 %v1047_v7 }
   0xe   :  { %595 = vmatprep.mubr.bf16.mxu1 %v1047_v7 }
   0xf   :  { %8 = vsyncpa [#allocation3], 0  ;;  %77 = vperm.xlu1 %1006, %v35_v30   ;;  %v36_v31 = vld [vmem:[%s1581_s1 + $0x20] sm:$0xff]  ;;  %v37_v32 = vld [vmem:[%s1581_s1 + $0x28] sm:$0xff] }
  0x10   :  { %82 = vperm.xlu0 %1005, %v36_v31   ;;  %v1009_v33 = vld [vmem:[%s1580_s0 + $0x10] sm:$0xff]   ;;  %v39_v35 = vld [vmem:[%s1581_s1 + $0x38] sm:$0xff]  ;;  %v40_v36 = vld [vmem:[%s1581_s1 + $0x40] sm:$0xff] }
  0x11   :  { %v38_v34 = vld [vmem:[%s1581_s1 + $0x30] sm:$0xff]  ;;  %v41_v37 = vld [vmem:[%s1581_s1 + $0x48] sm:$0xff]  ;;  %v1010_v38 = vld [vmem:[%s1580_s0 + $0x18] sm:$0xff]  }
  0x12   :  { %v42_v39 = vld [vmem:[%s1581_s1 + $0x50] sm:$0xff]  ;;  %v43_v40 = vld [vmem:[%s1581_s1 + $0x58] sm:$0xff]  ;;  %v44_v41 = vld [vmem:[%s1581_s1 + $0x60] sm:$0xff] }
  0x13   :  { %87 = vperm.xlu1 %1006, %v37_v32   ;;  %v45_v42 = vld [vmem:[%s1581_s1 + $0x68] sm:$0xff]  ;;  %v1011_v43 = vld [vmem:[%s1580_s0 + $0x20] sm:$0xff]   ;;  %v46_v44 = vld [vmem:[%s1581_s1 + $0x70] sm:$0xff] }
  0x14   :  { %914 = vmatmul.mubr.msk.bf16.gmra.mrb[4].mxu0 %vm180_vm0, %v1008_v28  ;;  %92 = vperm.xlu0 %1005, %v38_v34   ;;  %v47_v45 = vld [vmem:[%s1581_s1 + $0x78] sm:$0xff]  ;;  %v1012_v46 = vld [vmem:[%s1580_s0 + $0x28] sm:$0xff]   ;;  %v1013_v47 = vld [vmem:[%s1580_s0 + $0x30] sm:$0xff]  }
  0x15   :  { %946 = vmatmul.mubr.msk.bf16.gmra.mrb[4].mxu1 %vm180_vm0, %v1008_v28  ;;  %257 = vmatprep.mubr.bf16.mxu0 %v1047_v7  ;;  %v1014_v48 = vld [vmem:[%s1580_s0 + $0x38] sm:$0xff]   ;;  %s1048_s0 = smov [#allocation2]  }
  0x16   :  { %605 = vmatprep.mubr.bf16.mxu1 %v1047_v7  ;;  %s894_s8 = sshll.u32 %s1048_s0, 4  ;;  %s1561_s8 = int_to_ptr.vmem [resolvable:$true] %s894_s8 }
  0x17   :  { %97 = vperm.xlu1 %1006, %v39_v35   ;;  %s1023_s9 = scalar_lea.vmem %s1561_s8, 4096  ;;  %p1028_p1 = scmp.lt.s32.totalorder %s1561_s8, %s1561_s8 }
  0x18   :  { %102 = vperm.xlu0 %1005, %v40_v36   ;;  %p1024_p0 = scmp.ne.s32.totalorder %s1561_s8, %s1023_s9  ;;  %p1029_p2 = scmp.lt.s32.totalorder %s1023_s9, %s1023_s9 }
  0x1a   :  { %p1030_p3 = por %p1029_p2, %p1028_p1 }
  0x1b   :  { %107 = vperm.xlu1 %1006, %v41_v37  }
  0x1c   :  { %915 = vmatmul.mubr.msk.bf16.gmra.mrb[8].mxu0 %vm180_vm0, %v1009_v33  ;;  %112 = vperm.xlu0 %1005, %v42_v39   ;;  %p1031_p4 = pnand %p1030_p3, %p1024_p0 }
  0x1d   :  { %947 = vmatmul.mubr.msk.bf16.gmra.mrb[8].mxu1 %vm180_vm0, %v1009_v33  ;;  %267 = vmatprep.mubr.bf16.mxu0 %v1047_v7 }
  0x1e   :  { %615 = vmatprep.mubr.bf16.mxu1 %v1047_v7 }
  0x1f   :  { %117 = vperm.xlu1 %1006, %v43_v40  }
  0x20   :  { %122 = vperm.xlu0 %1005, %v44_v41  }
  0x23   :  { %127 = vperm.xlu1 %1006, %v45_v42  }
  0x24   :  { %916 = vmatmul.mubr.msk.bf16.gmra.mrb[12].mxu0 %vm180_vm0, %v1010_v38  ;;  %132 = vperm.xlu0 %1005, %v46_v44  }
  0x25   :  { %948 = vmatmul.mubr.msk.bf16.gmra.mrb[12].mxu1 %vm180_vm0, %v1010_v38  ;;  %277 = vmatprep.mubr.bf16.mxu0 %v1047_v7 }
  0x26   :  { %625 = vmatprep.mubr.bf16.mxu1 %v1047_v7 }
  0x27   :  { %137 = vperm.xlu1 %1006, %v47_v45  }
  0x2c   :  { %917 = vmatmul.mubr.msk.bf16.gmra.mrb[16].mxu0 %vm180_vm0, %v1011_v43 }
  0x2d   :  { %949 = vmatmul.mubr.msk.bf16.gmra.mrb[16].mxu1 %vm180_vm0, %v1011_v43  ;;  %287 = vmatprep.mubr.bf16.mxu0 %v1047_v7 }
  0x2e   :  { %635 = vmatprep.mubr.bf16.mxu1 %v1047_v7 }
  0x34   :  { %918 = vmatmul.mubr.msk.bf16.gmra.mrb[20].mxu0 %vm180_vm0, %v1012_v46 }
  0x35   :  { %950 = vmatmul.mubr.msk.bf16.gmra.mrb[20].mxu1 %vm180_vm0, %v1012_v46  ;;  %297 = vmatprep.mubr.bf16.mxu0 %v1047_v7 }
  0x36   :  { %645 = vmatprep.mubr.bf16.mxu1 %v1047_v7 }
  0x3c   :  { %919 = vmatmul.mubr.msk.bf16.gmra.mrb[24].mxu0 %vm180_vm0, %v1013_v47 }
  0x3d   :  { %951 = vmatmul.mubr.msk.bf16.gmra.mrb[24].mxu1 %vm180_vm0, %v1013_v47  ;;  %307 = vmatprep.mubr.bf16.mxu0 %v1047_v7 }
  0x3e   :  { %655 = vmatprep.mubr.bf16.mxu1 %v1047_v7 }
  0x44   :  { %920 = vmatmul.mubr.msk.bf16.gmra.mrb[28].mxu0 %vm180_vm0, %v1014_v48 }
  0x45   :  { %952 = vmatmul.mubr.msk.bf16.gmra.mrb[28].mxu1 %vm180_vm0, %v1014_v48 }
  0x87   :  { %v63_v49 = vpop.permute.xlu0 %62 }
  0x88   :  { %v73_v50 = vpop.permute.xlu1 %72 }
  0x8b   :  { %v68_v52 = vpop.permute.xlu0 %67 }
  0x8e   :  { %v78_v13 = vpop.permute.xlu1 %77 }
  0x8f   :  { %v83_v43 = vpop.permute.xlu0 %82 }
  0x92   :  { %v88_v47 = vpop.permute.xlu1 %87 }
  0xdf   :  { %v239_v51 = vpop.f32.mrb[0].mxu0 }
  0xe0   :  { %v1225_v53 = vadd.f32 %v239_v51, %v63_v49  ;;  %v587_v54 = vpop.f32.mrb[0].mxu1  ;;  %v241_v55 = vpop.f32.mrb[1].mxu0 }
  0xe1   :  { %v1227_v56 = vadd.f32 %v241_v55, %v63_v49  ;;  %v589_v57 = vpop.f32.mrb[1].mxu1  ;;  %v243_v58 = vpop.f32.mrb[2].mxu0  ;;  %v1231_v62 = vadd.f32 %v587_v54, %v63_v49 }
  0xe2   :  { %v1229_v59 = vadd.f32 %v243_v58, %v68_v52  ;;  %v591_v60 = vpop.f32.mrb[2].mxu1  ;;  %v245_v61 = vpop.f32.mrb[3].mxu0  ;;  %v318_v2 = vmul.f32 %v1225_v53, %v1225_v53  ;;  %v1239_v3 = vadd.f32 %v589_v57, %v63_v49 }
  0xe3   :  { %v1233_v63 = vadd.f32 %v591_v60, %v68_v52  ;;  %v1235_v0 = vadd.f32 %v245_v61, %v68_v52  ;;  %v593_v1 = vpop.f32.mrb[3].mxu1  ;;  %v319_v6 = vmul.f32 %v1227_v56, %v1227_v56  ;;  %v666_v11 = vmul.f32 %v1231_v62, %v1231_v62 }
  0xe4   :  { %1614 = vst [vmem:[#allocation6_spill] sm:$0xff] %v1239_v3  ;;  %v320_v4 = vmul.f32 %v1229_v59, %v1229_v59  ;;  %v1243_v5 = vadd.f32 %v593_v1, %v68_v52  ;;  %v667_v15 = vmul.f32 %v1239_v3, %v1239_v3 }
  0xe5   :  { %1613 = vst [vmem:[#allocation5_spill] sm:$0xff] %v1233_v63  ;;  %v668_v7 = vmul.f32 %v1233_v63, %v1233_v63  ;;  %v321_v8 = vmul.f32 %v1235_v0, %v1235_v0 }
  0xe6   :  { %1615 = vst [vmem:[#allocation7_spill] sm:$0xff] %v1243_v5  ;;  %v350_v9 = vadd.f32 %v320_v4, %v318_v2  ;;  %v669_v10 = vmul.f32 %v1243_v5, %v1243_v5 }
  0xe7   :  { %v371_v12 = vadd.f32 %v321_v8, %v319_v6  ;;  %v249_v14 = vpop.f32.mrb[4].mxu0  ;;  %v698_v19 = vadd.f32 %v668_v7, %v666_v11 }
  0xe8   :  { %v1257_v16 = vadd.f32 %v249_v14, %v73_v50  ;;  %v597_v17 = vpop.f32.mrb[4].mxu1  ;;  %v251_v18 = vpop.f32.mrb[5].mxu0  ;;  %v719_v24 = vadd.f32 %v669_v10, %v667_v15 }
  0xe9   :  { %v1259_v20 = vadd.f32 %v597_v17, %v73_v50  ;;  %v1261_v21 = vadd.f32 %v251_v18, %v73_v50  ;;  %v599_v22 = vpop.f32.mrb[5].mxu1  ;;  %v253_v23 = vpop.f32.mrb[6].mxu0 }
  0xea   :  { %v322_v25 = vmul.f32 %v1257_v16, %v1257_v16  ;;  %v1265_v26 = vadd.f32 %v599_v22, %v73_v50  ;;  %v1267_v27 = vadd.f32 %v253_v23, %v78_v13  ;;  %v601_v28 = vpop.f32.mrb[6].mxu1  ;;  %v255_v29 = vpop.f32.mrb[7].mxu0 }
  0xeb   :  { %1616 = vst [vmem:[#allocation8_spill] sm:$0xff] %v1259_v20  ;;  %v670_v30 = vmul.f32 %v1259_v20, %v1259_v20  ;;  %v323_v31 = vmul.f32 %v1261_v21, %v1261_v21  ;;  %v1273_v32 = vadd.f32 %v601_v28, %v78_v13  ;;  %v1275_v33 = vadd.f32 %v255_v29, %v78_v13  ;;  %v603_v34 = vpop.f32.mrb[7].mxu1 }
  0xec   :  { %1617 = vst [vmem:[#allocation9_spill] sm:$0xff] %v1265_v26  ;;  %v351_v35 = vadd.f32 %v350_v9, %v322_v25  ;;  %v671_v36 = vmul.f32 %v1265_v26, %v1265_v26  ;;  %v324_v37 = vmul.f32 %v1267_v27, %v1267_v27  ;;  %v1281_v38 = vadd.f32 %v603_v34, %v78_v13 }
  0xed   :  { %1618 = vst [vmem:[#allocation10_spill] sm:$0xff] %v1273_v32  ;;  %v699_v39 = vadd.f32 %v698_v19, %v670_v30  ;;  %v372_v40 = vadd.f32 %v371_v12, %v323_v31  ;;  %v672_v41 = vmul.f32 %v1273_v32, %v1273_v32  ;;  %v325_v42 = vmul.f32 %v1275_v33, %v1275_v33  ;;  %v98_v30 = vpop.permute.xlu1 %97 }
  0xee   :  { %1619 = vst [vmem:[#allocation11_spill] sm:$0xff] %v1281_v38  ;;  %v720_v44 = vadd.f32 %v719_v24, %v671_v36  ;;  %v352_v45 = vadd.f32 %v351_v35, %v324_v37  ;;  %v673_v46 = vmul.f32 %v1281_v38, %v1281_v38  ;;  %v93_v24 = vpop.permute.xlu0 %92 }
  0xef   :  { %v373_v48 = vadd.f32 %v372_v40, %v325_v42  ;;  %v259_v49 = vpop.f32.mrb[8].mxu0  ;;  %v700_v54 = vadd.f32 %v699_v39, %v672_v41 }
  0xf0   :  { %v1289_v50 = vadd.f32 %v259_v49, %v83_v43  ;;  %v607_v51 = vpop.f32.mrb[8].mxu1  ;;  %v261_v52 = vpop.f32.mrb[9].mxu0  ;;  %v721_v61 = vadd.f32 %v720_v44, %v673_v46 }
  0xf1   :  { %v1291_v55 = vadd.f32 %v607_v51, %v83_v43  ;;  %v1293_v57 = vadd.f32 %v261_v52, %v83_v43  ;;  %v609_v58 = vpop.f32.mrb[9].mxu1  ;;  %v263_v60 = vpop.f32.mrb[10].mxu0 }
  0xf2   :  { %v326_v1 = vmul.f32 %v1289_v50, %v1289_v50  ;;  %v1297_v2 = vadd.f32 %v609_v58, %v83_v43  ;;  %v1299_v4 = vadd.f32 %v263_v60, %v88_v47  ;;  %v611_v6 = vpop.f32.mrb[10].mxu1  ;;  %v265_v7 = vpop.f32.mrb[11].mxu0 }
  0xf3   :  { %1620 = vst [vmem:[#allocation12_spill] sm:$0xff] %v1291_v55  ;;  %v674_v8 = vmul.f32 %v1291_v55, %v1291_v55  ;;  %v327_v9 = vmul.f32 %v1293_v57, %v1293_v57  ;;  %v1305_v10 = vadd.f32 %v611_v6, %v88_v47  ;;  %v1307_v11 = vadd.f32 %v265_v7, %v88_v47  ;;  %v613_v12 = vpop.f32.mrb[11].mxu1 }
  0xf4   :  { %1621 = vst [vmem:[#allocation13_spill] sm:$0xff] %v1297_v2  ;;  %v353_v13 = vadd.f32 %v352_v45, %v326_v1  ;;  %v675_v14 = vmul.f32 %v1297_v2, %v1297_v2  ;;  %v328_v15 = vmul.f32 %v1299_v4, %v1299_v4  ;;  %v1313_v17 = vadd.f32 %v613_v12, %v88_v47 }
  0xf5   :  { %1622 = vst [vmem:[#allocation14_spill] sm:$0xff] %v1305_v10  ;;  %v701_v18 = vadd.f32 %v700_v54, %v674_v8  ;;  %v374_v19 = vadd.f32 %v373_v48, %v327_v9  ;;  %v676_v22 = vmul.f32 %v1305_v10, %v1305_v10  ;;  %v329_v23 = vmul.f32 %v1307_v11, %v1307_v11 }
  0xf6   :  { %1623 = vst [vmem:[#allocation15_spill] sm:$0xff] %v1313_v17  ;;  %v722_v25 = vadd.f32 %v721_v61, %v675_v14  ;;  %v354_v28 = vadd.f32 %v353_v13, %v328_v15  ;;  %v677_v29 = vmul.f32 %v1313_v17, %v1313_v17  ;;  %v103_v14 = vpop.permute.xlu0 %102 }
  0xf7   :  { %v375_v31 = vadd.f32 %v374_v19, %v329_v23  ;;  %v269_v34 = vpop.f32.mrb[12].mxu0  ;;  %v702_v39 = vadd.f32 %v701_v18, %v676_v22  ;;  %v108_v22 = vpop.permute.xlu1 %107 }
  0xf8   :  { %v1321_v35 = vadd.f32 %v269_v34, %v93_v24  ;;  %v617_v36 = vpop.f32.mrb[12].mxu1  ;;  %v271_v37 = vpop.f32.mrb[13].mxu0  ;;  %v723_v44 = vadd.f32 %v722_v25, %v677_v29 }
  0xf9   :  { %v1323_v40 = vadd.f32 %v617_v36, %v93_v24  ;;  %v1325_v41 = vadd.f32 %v271_v37, %v93_v24  ;;  %v619_v42 = vpop.f32.mrb[13].mxu1  ;;  %v273_v43 = vpop.f32.mrb[14].mxu0 }
  0xfa   :  { %v330_v45 = vmul.f32 %v1321_v35, %v1321_v35  ;;  %v1329_v46 = vadd.f32 %v619_v42, %v93_v24  ;;  %v1331_v47 = vadd.f32 %v273_v43, %v98_v30  ;;  %v621_v48 = vpop.f32.mrb[14].mxu1  ;;  %v275_v49 = vpop.f32.mrb[15].mxu0 }
  0xfb   :  { %1624 = vst [vmem:[#allocation16_spill] sm:$0xff] %v1323_v40  ;;  %v678_v51 = vmul.f32 %v1323_v40, %v1323_v40  ;;  %v331_v52 = vmul.f32 %v1325_v41, %v1325_v41  ;;  %v1337_v54 = vadd.f32 %v621_v48, %v98_v30  ;;  %v1339_v58 = vadd.f32 %v275_v49, %v98_v30  ;;  %v623_v60 = vpop.f32.mrb[15].mxu1 }
  0xfc   :  { %1625 = vst [vmem:[#allocation17_spill] sm:$0xff] %v1329_v46  ;;  %v355_v61 = vadd.f32 %v354_v28, %v330_v45  ;;  %v679_v1 = vmul.f32 %v1329_v46, %v1329_v46  ;;  %v332_v6 = vmul.f32 %v1331_v47, %v1331_v47  ;;  %v1345_v7 = vadd.f32 %v623_v60, %v98_v30 }
  0xfd   :  { %1626 = vst [vmem:[#allocation18_spill] sm:$0xff] %v1337_v54  ;;  %v703_v8 = vadd.f32 %v702_v39, %v678_v51  ;;  %v376_v9 = vadd.f32 %v375_v31, %v331_v52  ;;  %v680_v12 = vmul.f32 %v1337_v54, %v1337_v54  ;;  %v333_v13 = vmul.f32 %v1339_v58, %v1339_v58 }
  0xfe   :  { %1627 = vst [vmem:[#allocation19_spill] sm:$0xff] %v1345_v7  ;;  %v724_v15 = vadd.f32 %v723_v44, %v679_v1  ;;  %v356_v18 = vadd.f32 %v355_v61, %v332_v6  ;;  %v681_v19 = vmul.f32 %v1345_v7, %v1345_v7 }
  0xff   :  { %v704_v23 = vadd.f32 %v703_v8, %v680_v12  ;;  %v377_v24 = vadd.f32 %v376_v9, %v333_v13  ;;  %v279_v25 = vpop.f32.mrb[16].mxu0 }
 0x100   :  { %v725_v28 = vadd.f32 %v724_v15, %v681_v19  ;;  %v1353_v29 = vadd.f32 %v279_v25, %v103_v14  ;;  %v627_v30 = vpop.f32.mrb[16].mxu1  ;;  %v281_v31 = vpop.f32.mrb[17].mxu0 }
 0x101   :  { %v1355_v34 = vadd.f32 %v627_v30, %v103_v14  ;;  %v1357_v36 = vadd.f32 %v281_v31, %v103_v14  ;;  %v629_v37 = vpop.f32.mrb[17].mxu1  ;;  %v283_v39 = vpop.f32.mrb[18].mxu0 }
 0x102   :  { %v334_v42 = vmul.f32 %v1353_v29, %v1353_v29  ;;  %v1361_v43 = vadd.f32 %v629_v37, %v103_v14  ;;  %v1363_v44 = vadd.f32 %v283_v39, %v108_v22  ;;  %v631_v45 = vpop.f32.mrb[18].mxu1  ;;  %v285_v48 = vpop.f32.mrb[19].mxu0 }
 0x103   :  { %1628 = vst [vmem:[#allocation20_spill] sm:$0xff] %v1355_v34  ;;  %v682_v49 = vmul.f32 %v1355_v34, %v1355_v34  ;;  %v335_v51 = vmul.f32 %v1357_v36, %v1357_v36  ;;  %v1369_v52 = vadd.f32 %v631_v45, %v108_v22  ;;  %v1371_v60 = vadd.f32 %v285_v48, %v108_v22  ;;  %v633_v61 = vpop.f32.mrb[19].mxu1  ;;  %v113_v19 = vpop.permute.xlu0 %112 }
 0x104   :  { %1629 = vst [vmem:[#allocation21_spill] sm:$0xff] %v1361_v43  ;;  %v357_v1 = vadd.f32 %v356_v18, %v334_v42  ;;  %v683_v6 = vmul.f32 %v1361_v43, %v1361_v43  ;;  %v336_v8 = vmul.f32 %v1363_v44, %v1363_v44  ;;  %v1377_v9 = vadd.f32 %v633_v61, %v108_v22  ;;  %v118_v31 = vpop.permute.xlu1 %117 }
 0x105   :  { %1630 = vst [vmem:[#allocation22_spill] sm:$0xff] %v1369_v52  ;;  %v705_v12 = vadd.f32 %v704_v23, %v682_v49  ;;  %v378_v13 = vadd.f32 %v377_v24, %v335_v51  ;;  %v684_v14 = vmul.f32 %v1369_v52, %v1369_v52  ;;  %v337_v15 = vmul.f32 %v1371_v60, %v1371_v60 }
 0x106   :  { %1631 = vst [vmem:[#allocation23_spill] sm:$0xff] %v1377_v9  ;;  %v726_v25 = vadd.f32 %v725_v28, %v683_v6  ;;  %v358_v30 = vadd.f32 %v357_v1, %v336_v8  ;;  %v685_v18 = vmul.f32 %v1377_v9, %v1377_v9 }
 0x107   :  { %v706_v37 = vadd.f32 %v705_v12, %v684_v14  ;;  %v379_v39 = vadd.f32 %v378_v13, %v337_v15  ;;  %v289_v42 = vpop.f32.mrb[20].mxu0 }
 0x108   :  { %v727_v22 = vadd.f32 %v726_v25, %v685_v18  ;;  %v1385_v45 = vadd.f32 %v289_v42, %v113_v19  ;;  %v637_v23 = vpop.f32.mrb[20].mxu1  ;;  %v291_v24 = vpop.f32.mrb[21].mxu0 }
 0x109   :  { %v1387_v48 = vadd.f32 %v637_v23, %v113_v19  ;;  %v1389_v49 = vadd.f32 %v291_v24, %v113_v19  ;;  %v639_v51 = vpop.f32.mrb[21].mxu1  ;;  %v293_v61 = vpop.f32.mrb[22].mxu0 }
 0x10a   :  { %v338_v28 = vmul.f32 %v1385_v45, %v1385_v45  ;;  %v1393_v1 = vadd.f32 %v639_v51, %v113_v19  ;;  %v1395_v6 = vadd.f32 %v293_v61, %v118_v31  ;;  %v641_v8 = vpop.f32.mrb[22].mxu1  ;;  %v295_v12 = vpop.f32.mrb[23].mxu0 }
 0x10b   :  { %1632 = vst [vmem:[#allocation24_spill] sm:$0xff] %v1387_v48  ;;  %v686_v13 = vmul.f32 %v1387_v48, %v1387_v48  ;;  %v339_v14 = vmul.f32 %v1389_v49, %v1389_v49  ;;  %v1401_v15 = vadd.f32 %v641_v8, %v118_v31  ;;  %v1403_v25 = vadd.f32 %v295_v12, %v118_v31  ;;  %v643_v18 = vpop.f32.mrb[23].mxu1  ;;  %v123_v12 = vpop.permute.xlu0 %122 }
 0x10c   :  { %1633 = vst [vmem:[#allocation25_spill] sm:$0xff] %v1393_v1  ;;  %v359_v42 = vadd.f32 %v358_v30, %v338_v28  ;;  %v687_v19 = vmul.f32 %v1393_v1, %v1393_v1  ;;  %v340_v23 = vmul.f32 %v1395_v6, %v1395_v6  ;;  %v1409_v24 = vadd.f32 %v643_v18, %v118_v31  ;;  %v128_v28 = vpop.permute.xlu1 %127 }
 0x10d   :  { %1634 = vst [vmem:[#allocation26_spill] sm:$0xff] %v1401_v15  ;;  %v707_v51 = vadd.f32 %v706_v37, %v686_v13  ;;  %v380_v61 = vadd.f32 %v379_v39, %v339_v14  ;;  %v688_v48 = vmul.f32 %v1401_v15, %v1401_v15  ;;  %v341_v8 = vmul.f32 %v1403_v25, %v1403_v25 }
 0x10e   :  { %1635 = vst [vmem:[#allocation27_spill] sm:$0xff] %v1409_v24  ;;  %v728_v9 = vadd.f32 %v727_v22, %v687_v19  ;;  %v360_v52 = vadd.f32 %v359_v42, %v340_v23  ;;  %v689_v30 = vmul.f32 %v1409_v24, %v1409_v24 }
 0x10f   :  { %v708_v1 = vadd.f32 %v707_v51, %v688_v48  ;;  %v381_v43 = vadd.f32 %v380_v61, %v341_v8  ;;  %v299_v34 = vpop.f32.mrb[24].mxu0 }
 0x110   :  { %v729_v31 = vadd.f32 %v728_v9, %v689_v30  ;;  %v1417_v18 = vadd.f32 %v299_v34, %v123_v12  ;;  %v647_v37 = vpop.f32.mrb[24].mxu1  ;;  %v301_v39 = vpop.f32.mrb[25].mxu0 }
 0x111   :  { %v1419_v13 = vadd.f32 %v647_v37, %v123_v12  ;;  %v1421_v14 = vadd.f32 %v301_v39, %v123_v12  ;;  %v649_v15 = vpop.f32.mrb[25].mxu1  ;;  %v303_v7 = vpop.f32.mrb[26].mxu0 }
 0x112   :  { %v342_v22 = vmul.f32 %v1417_v18, %v1417_v18  ;;  %v1425_v42 = vadd.f32 %v649_v15, %v123_v12  ;;  %v1427_v19 = vadd.f32 %v303_v7, %v128_v28  ;;  %v651_v48 = vpop.f32.mrb[26].mxu1  ;;  %v305_v23 = vpop.f32.mrb[27].mxu0 }
 0x113   :  { %1636 = vst [vmem:[#allocation28_spill] sm:$0xff] %v1419_v13  ;;  %v690_v34 = vmul.f32 %v1419_v13, %v1419_v13  ;;  %v343_v9 = vmul.f32 %v1421_v14, %v1421_v14  ;;  %v1433_v51 = vadd.f32 %v651_v48, %v128_v28  ;;  %v1435_v61 = vadd.f32 %v305_v23, %v128_v28  ;;  %v653_v8 = vpop.f32.mrb[27].mxu1  ;;  %v133_v23 = vpop.permute.xlu0 %132 }
 0x114   :  { %1637 = vst [vmem:[#allocation29_spill] sm:$0xff] %v1425_v42  ;;  %v361_v30 = vadd.f32 %v360_v52, %v342_v22  ;;  %v691_v15 = vmul.f32 %v1425_v42, %v1425_v42  ;;  %v344_v7 = vmul.f32 %v1427_v19, %v1427_v19  ;;  %v1441_v12 = vadd.f32 %v653_v8, %v128_v28  ;;  %v138_v22 = vpop.permute.xlu1 %137 }
 0x115   :  { %1638 = vst [vmem:[#allocation30_spill] sm:$0xff] %v1433_v51  ;;  %v709_v37 = vadd.f32 %v708_v1, %v690_v34  ;;  %v382_v39 = vadd.f32 %v381_v43, %v343_v9  ;;  %v692_v13 = vmul.f32 %v1433_v51, %v1433_v51  ;;  %v345_v48 = vmul.f32 %v1435_v61, %v1435_v61 }
 0x116   :  { %1639 = vst [vmem:[#allocation31_spill] sm:$0xff] %v1441_v12  ;;  %v730_v24 = vadd.f32 %v729_v31, %v691_v15  ;;  %v362_v54 = vadd.f32 %v361_v30, %v344_v7  ;;  %v693_v52 = vmul.f32 %v1441_v12, %v1441_v12 }
 0x117   :  { %v710_v42 = vadd.f32 %v709_v37, %v692_v13  ;;  %v383_v46 = vadd.f32 %v382_v39, %v345_v48  ;;  %v309_v40 = vpop.f32.mrb[28].mxu0 }
 0x118   :  { %v731_v28 = vadd.f32 %v730_v24, %v693_v52  ;;  %v1449_v8 = vadd.f32 %v309_v40, %v133_v23  ;;  %v657_v43 = vpop.f32.mrb[28].mxu1  ;;  %v311_v1 = vpop.f32.mrb[29].mxu0 }
 0x119   :  { %v1451_v34 = vadd.f32 %v657_v43, %v133_v23  ;;  %v1453_v9 = vadd.f32 %v311_v1, %v133_v23  ;;  %v659_v51 = vpop.f32.mrb[29].mxu1  ;;  %v313_v17 = vpop.f32.mrb[30].mxu0 }
 0x11a   :  { %v346_v31 = vmul.f32 %v1449_v8, %v1449_v8  ;;  %v1457_v30 = vadd.f32 %v659_v51, %v133_v23  ;;  %v314_v15 = vadd.f32 %v313_v17, %v138_v22  ;;  %v661_v13 = vpop.f32.mrb[30].mxu1  ;;  %v315_v7 = vpop.f32.mrb[31].mxu0 }
 0x11b   :  { %1640 = vst [vmem:[#allocation32_spill] sm:$0xff] %v1451_v34  ;;  %v694_v40 = vmul.f32 %v1451_v34, %v1451_v34  ;;  %v347_v24 = vmul.f32 %v1453_v9, %v1453_v9  ;;  %v662_v37 = vadd.f32 %v661_v13, %v138_v22  ;;  %v316_v39 = vadd.f32 %v315_v7, %v138_v22  ;;  %v663_v48 = vpop.f32.mrb[31].mxu1 }
 0x11c   :  { %1641 = vst [vmem:[#allocation33_spill] sm:$0xff] %v1457_v30  ;;  %v363_v52 = vadd.f32 %v362_v54, %v346_v31  ;;  %v695_v43 = vmul.f32 %v1457_v30, %v1457_v30  ;;  %v348_v1 = vmul.f32 %v314_v15, %v314_v15  ;;  %v664_v12 = vadd.f32 %v663_v48, %v138_v22 }
 0x11d   :  { %v711_v51 = vadd.f32 %v710_v42, %v694_v40  ;;  %v384_v23 = vadd.f32 %v383_v46, %v347_v24  ;;  %v696_v17 = vmul.f32 %v662_v37, %v662_v37  ;;  %v349_v10 = vmul.f32 %v316_v39, %v316_v39 }
 0x11e   :  { %v732_v2 = vadd.f32 %v731_v28, %v695_v43  ;;  %v364_v55 = vadd.f32 %v363_v52, %v348_v1  ;;  %v697_v38 = vmul.f32 %v664_v12, %v664_v12 }
 0x11f   :  { %v712_v34 = vadd.f32 %v711_v51, %v696_v17  ;;  %v385_v32 = vadd.f32 %v384_v23, %v349_v10 }
 0x120   :  { %v365_v26 = vrot.slane %v364_v55, 4  ;;  %v733_v20 = vadd.f32 %v732_v2, %v697_v38 }
 0x121   :  { %v713_v13 = vrot.slane %v712_v34, 4  ;;  %v386_v7 = vrot.slane %v385_v32, 4 }
 0x122   :  { %v366_v5 = vadd.f32 %v365_v26, %v364_v55  ;;  %v734_v54 = vrot.slane %v733_v20, 4 }
 0x123   :  { %v714_v31 = vadd.f32 %v713_v13, %v712_v34  ;;  %v387_v63 = vadd.f32 %v386_v7, %v385_v32 }
 0x124   :  { %v367_v30 = vrot.slane %v366_v5, 2  ;;  %v735_v3 = vadd.f32 %v734_v54, %v733_v20 }
 0x125   :  { %v715_v22 = vrot.slane %v714_v31, 2  ;;  %v388_v42 = vrot.slane %v387_v63, 2 }
 0x126   :  { %v368_v46 = vadd.f32 %v367_v30, %v366_v5  ;;  %v736_v40 = vrot.slane %v735_v3, 2 }
 0x127   :  { %v716_v24 = vadd.f32 %v715_v22, %v714_v31  ;;  %v389_v28 = vadd.f32 %v388_v42, %v387_v63 }
 0x128   :  { %v369_v48 = vrot.slane %v368_v46, 1  ;;  %v737_v52 = vadd.f32 %v736_v40, %v735_v3 }
 0x129   :  { %v717_v43 = vrot.slane %v716_v24, 1  ;;  %v390_v10 = vrot.slane %v389_v28, 1 }
 0x12a   :  { %v370_v1 = vadd.f32 %v369_v48, %v368_v46  ;;  %v738_v38 = vrot.slane %v737_v52, 1 }
 0x12b   :  { %v718_v2 = vadd.f32 %v717_v43, %v716_v24  ;;  %v391_v51 = vadd.f32 %v390_v10, %v389_v28 }
 0x12c   :  { %v392_v26 = vmax.f32 %v370_v1, 1e-24  ;;  %v739_v55 = vadd.f32 %v738_v38, %v737_v52 }
 0x12d   :  { %v740_v34 = vmax.f32 %v718_v2, 1e-24  ;;  %v393_v32 = vmax.f32 %v391_v51, 1e-24  ;;  %v1642_v2 = vld [vmem:[#allocation6_spill] sm:$0xff] }
 0x12e   :  { %1015 = vrsqrt.f32 %v392_v26  ;;  %v741_v20 = vmax.f32 %v739_v55, 1e-24  ;;  %v1643_v26 = vld [vmem:[#allocation5_spill] sm:$0xff] }
 0x12f   :  { %1017 = vrsqrt.f32 %v740_v34  ;;  %v1644_v34 = vld [vmem:[#allocation7_spill] sm:$0xff] }
 0x130   :  { %1019 = vrsqrt.f32 %v393_v32 }
 0x131   :  { %1021 = vrsqrt.f32 %v741_v20  ;;  %v1645_v20 = vld [vmem:[#allocation8_spill] sm:$0xff] }
 0x138   :  { %v1016_v5 = vpop.eup %1015 }
 0x139   :  { %v1465_v30 = vpop.eup %1017  ;;  %v426_v63 = vmul.f32 %v1016_v5, %v314_v15  ;;  %v396_v3 = vmul.f32 %v1016_v5, %v1225_v53  ;;  %v398_v23 = vmul.f32 %v1016_v5, %v1229_v59  ;;  %v400_v17 = vmul.f32 %v1016_v5, %v1257_v16 }
 0x13a   :  { %v1020_v13 = vpop.eup %1019  ;;  %v774_v7 = vmul.f32 %v1465_v30, %v662_v37  ;;  %v402_v54 = vmul.f32 %v1016_v5, %v1267_v27  ;;  %v404_v31 = vmul.f32 %v1016_v5, %v1289_v50  ;;  %v406_v22 = vmul.f32 %v1016_v5, %v1299_v4 }
 0x13b   :  { %v1474_v42 = vpop.eup %1021  ;;  %v427_v46 = vmul.f32 %v1020_v13, %v316_v39  ;;  %v397_v15 = vmul.f32 %v1020_v13, %v1227_v56  ;;  %v399_v53 = vmul.f32 %v1020_v13, %v1235_v0  ;;  %v401_v59 = vmul.f32 %v1020_v13, %v1261_v21 }
 0x13c   :  { %v775_v16 = vmul.f32 %v1474_v42, %v664_v12  ;;  %v403_v40 = vmul.f32 %v1020_v13, %v1275_v33  ;;  %v405_v37 = vmul.f32 %v1020_v13, %v1293_v57  ;;  %v407_v27 = vmul.f32 %v1020_v13, %v1307_v11 }
 0x13d   :  { %v984_v50 = vpack.c.bf16 %v427_v46, %v426_v63  ;;  %v408_v4 = vmul.f32 %v1016_v5, %v1321_v35  ;;  %v409_v24 = vmul.f32 %v1020_v13, %v1325_v41  ;;  %v410_v39 = vmul.f32 %v1016_v5, %v1331_v47  ;;  %v1651_v46 = vld [vmem:[#allocation14_spill] sm:$0xff] }
 0x13e   :  { %v1000_v56 = vpack.c.bf16 %v775_v16, %v774_v7  ;;  %v411_v0 = vmul.f32 %v1020_v13, %v1339_v58  ;;  %v412_v21 = vmul.f32 %v1016_v5, %v1353_v29  ;;  %v413_v12 = vmul.f32 %v1020_v13, %v1357_v36  ;;  %v1649_v7 = vld [vmem:[#allocation12_spill] sm:$0xff] }
 0x13f   :  { %539 = vst [vmem:[#allocation2 + $0x78] sm:$0xff] %v984_v50  ;;  %v414_v33 = vmul.f32 %v1016_v5, %v1363_v44  ;;  %v415_v57 = vmul.f32 %v1020_v13, %v1371_v60  ;;  %v416_v11 = vmul.f32 %v1016_v5, %v1385_v45  ;;  %v417_v35 = vmul.f32 %v1020_v13, %v1389_v49  ;;  %v1653_v16 = vld [vmem:[#allocation16_spill] sm:$0xff]  ;;  %v1655_v50 = vld [vmem:[#allocation18_spill] sm:$0xff] }
 0x140   :  { %888 = vst [vmem:[#allocation2 + $0xf8] sm:$0xff] %v1000_v56  ;;  %v418_v41 = vmul.f32 %v1016_v5, %v1395_v6  ;;  %v419_v47 = vmul.f32 %v1020_v13, %v1403_v25  ;;  %v420_v58 = vmul.f32 %v1016_v5, %v1417_v18  ;;  %v421_v29 = vmul.f32 %v1020_v13, %v1421_v14  ;;  %v1657_v56 = vld [vmem:[#allocation20_spill] sm:$0xff] }
 0x141   :  { %v422_v36 = vmul.f32 %v1016_v5, %v1427_v19  ;;  %v423_v28 = vmul.f32 %v1020_v13, %v1435_v61  ;;  %v424_v44 = vmul.f32 %v1016_v5, %v1449_v8  ;;  %v425_v60 = vmul.f32 %v1020_v13, %v1453_v9 }
 0x142   :  { %v969_v45 = vpack.c.bf16 %v397_v15, %v396_v3  ;;  %v970_v48 = vpack.c.bf16 %v399_v53, %v398_v23  ;;  %v971_v49 = vpack.c.bf16 %v401_v59, %v400_v17  ;;  %v972_v52 = vpack.c.bf16 %v403_v40, %v402_v54  ;;  %v1647_v3 = vld [vmem:[#allocation10_spill] sm:$0xff]  ;;  %v1648_v17 = vld [vmem:[#allocation11_spill] sm:$0xff] }
 0x143   :  { %v973_v43 = vpack.c.bf16 %v405_v37, %v404_v31  ;;  %v974_v6 = vpack.c.bf16 %v407_v27, %v406_v22  ;;  %v975_v10 = vpack.c.bf16 %v409_v24, %v408_v4  ;;  %v976_v25 = vpack.c.bf16 %v411_v0, %v410_v39  ;;  %v1650_v31 = vld [vmem:[#allocation13_spill] sm:$0xff]  ;;  %v1652_v53 = vld [vmem:[#allocation15_spill] sm:$0xff] }
 0x144   :  { %v977_v1 = vpack.c.bf16 %v413_v12, %v412_v21  ;;  %v978_v18 = vpack.c.bf16 %v415_v57, %v414_v33  ;;  %v979_v38 = vpack.c.bf16 %v417_v35, %v416_v11  ;;  %v980_v14 = vpack.c.bf16 %v419_v47, %v418_v41  ;;  %524 = vst [vmem:[#allocation2] sm:$0xff] %v969_v45  ;;  %v1654_v37 = vld [vmem:[#allocation17_spill] sm:$0xff]  ;;  %v1656_v24 = vld [vmem:[#allocation19_spill] sm:$0xff]  ;;  %v1659_v33 = vld [vmem:[#allocation22_spill] sm:$0xff] }
 0x145   :  { %525 = vst [vmem:[#allocation2 + $0x8] sm:$0xff] %v970_v48  ;;  %526 = vst [vmem:[#allocation2 + $0x10] sm:$0xff] %v971_v49  ;;  %v981_v19 = vpack.c.bf16 %v421_v29, %v420_v58  ;;  %v982_v61 = vpack.c.bf16 %v423_v28, %v422_v36  ;;  %v983_v8 = vpack.c.bf16 %v425_v60, %v424_v44  ;;  %v1658_v21 = vld [vmem:[#allocation21_spill] sm:$0xff]  ;;  %v1660_v11 = vld [vmem:[#allocation23_spill] sm:$0xff] }
 0x146   :  { %527 = vst [vmem:[#allocation2 + $0x18] sm:$0xff] %v972_v52  ;;  %528 = vst [vmem:[#allocation2 + $0x20] sm:$0xff] %v973_v43  ;;  %v744_v9 = vmul.f32 %v1465_v30, %v1231_v62  ;;  %v745_v51 = vmul.f32 %v1474_v42, %v1642_v2  ;;  %v746_v55 = vmul.f32 %v1465_v30, %v1643_v26  ;;  %v1646_v62 = vld [vmem:[#allocation9_spill] sm:$0xff]  ;;  %v1661_v41 = vld [vmem:[#allocation24_spill] sm:$0xff] }
 0x147   :  { %529 = vst [vmem:[#allocation2 + $0x28] sm:$0xff] %v974_v6  ;;  %530 = vst [vmem:[#allocation2 + $0x30] sm:$0xff] %v975_v10  ;;  %v747_v32 = vmul.f32 %v1474_v42, %v1644_v34  ;;  %v748_v5 = vmul.f32 %v1465_v30, %v1645_v20  ;;  %v749_v63 = vmul.f32 %v1474_v42, %v1646_v62  ;;  %v1662_v58 = vld [vmem:[#allocation25_spill] sm:$0xff]  ;;  %v1663_v36 = vld [vmem:[#allocation26_spill] sm:$0xff] }
 0x148   :  { %531 = vst [vmem:[#allocation2 + $0x38] sm:$0xff] %v976_v25  ;;  %532 = vst [vmem:[#allocation2 + $0x40] sm:$0xff] %v977_v1  ;;  %v750_v23 = vmul.f32 %v1465_v30, %v1647_v3  ;;  %v751_v13 = vmul.f32 %v1474_v42, %v1648_v17  ;;  %v752_v54 = vmul.f32 %v1465_v30, %v1649_v7  ;;  %v1664_v44 = vld [vmem:[#allocation27_spill] sm:$0xff]  ;;  %v1665_v45 = vld [vmem:[#allocation28_spill] sm:$0xff] }
 0x149   :  { %533 = vst [vmem:[#allocation2 + $0x48] sm:$0xff] %v978_v18  ;;  %534 = vst [vmem:[#allocation2 + $0x50] sm:$0xff] %v979_v38  ;;  %v753_v22 = vmul.f32 %v1474_v42, %v1650_v31  ;;  %v754_v15 = vmul.f32 %v1465_v30, %v1651_v46  ;;  %v755_v59 = vmul.f32 %v1474_v42, %v1652_v53  ;;  %v1666_v49 = vld [vmem:[#allocation29_spill] sm:$0xff]  ;;  %v1667_v43 = vld [vmem:[#allocation30_spill] sm:$0xff] }
 0x14a   :  { %535 = vst [vmem:[#allocation2 + $0x58] sm:$0xff] %v980_v14  ;;  %536 = vst [vmem:[#allocation2 + $0x60] sm:$0xff] %v981_v19  ;;  %v756_v40 = vmul.f32 %v1465_v30, %v1653_v16  ;;  %v757_v27 = vmul.f32 %v1474_v42, %v1654_v37  ;;  %v758_v4 = vmul.f32 %v1465_v30, %v1655_v50  ;;  %v1668_v10 = vld [vmem:[#allocation31_spill] sm:$0xff]  ;;  %v1669_v1 = vld [vmem:[#allocation32_spill] sm:$0xff] }
 0x14b   :  { %537 = vst [vmem:[#allocation2 + $0x68] sm:$0xff] %v982_v61  ;;  %538 = vst [vmem:[#allocation2 + $0x70] sm:$0xff] %v983_v8  ;;  %v759_v39 = vmul.f32 %v1474_v42, %v1656_v24  ;;  %v760_v0 = vmul.f32 %v1465_v30, %v1657_v56  ;;  %v761_v12 = vmul.f32 %v1474_v42, %v1658_v21  ;;  %v1670_v38 = vld [vmem:[#allocation33_spill] sm:$0xff] }
 0x14c   :  { %v762_v57 = vmul.f32 %v1465_v30, %v1659_v33  ;;  %v763_v35 = vmul.f32 %v1474_v42, %v1660_v11  ;;  %v764_v47 = vmul.f32 %v1465_v30, %v1661_v41  ;;  %v765_v29 = vmul.f32 %v1474_v42, %v1662_v58 }
 0x14d   :  { %v766_v28 = vmul.f32 %v1465_v30, %v1663_v36  ;;  %v767_v60 = vmul.f32 %v1474_v42, %v1664_v44  ;;  %v768_v48 = vmul.f32 %v1465_v30, %v1665_v45  ;;  %v769_v52 = vmul.f32 %v1474_v42, %v1666_v49 }
 0x14e   :  { %v770_v6 = vmul.f32 %v1465_v30, %v1667_v43  ;;  %v771_v25 = vmul.f32 %v1474_v42, %v1668_v10  ;;  %v772_v18 = vmul.f32 %v1465_v30, %v1669_v1  ;;  %v773_v14 = vmul.f32 %v1474_v42, %v1670_v38 }
 0x14f   :  { %v985_v19 = vpack.c.bf16 %v745_v51, %v744_v9  ;;  %v986_v61 = vpack.c.bf16 %v747_v32, %v746_v55  ;;  %v987_v8 = vpack.c.bf16 %v749_v63, %v748_v5  ;;  %v988_v2 = vpack.c.bf16 %v751_v13, %v750_v23 }
 0x150   :  { %v989_v26 = vpack.c.bf16 %v753_v22, %v752_v54  ;;  %v990_v34 = vpack.c.bf16 %v755_v59, %v754_v15  ;;  %v991_v20 = vpack.c.bf16 %v757_v27, %v756_v40  ;;  %v992_v62 = vpack.c.bf16 %v759_v39, %v758_v4 }
 0x151   :  { %v993_v3 = vpack.c.bf16 %v761_v12, %v760_v0  ;;  %v994_v17 = vpack.c.bf16 %v763_v35, %v762_v57  ;;  %v995_v7 = vpack.c.bf16 %v765_v29, %v764_v47  ;;  %873 = vst [vmem:[#allocation2 + $0x80] sm:$0xff] %v985_v19  ;;  %874 = vst [vmem:[#allocation2 + $0x88] sm:$0xff] %v986_v61 }
 0x152   :  { %875 = vst [vmem:[#allocation2 + $0x90] sm:$0xff] %v987_v8  ;;  %v996_v30 = vpack.c.bf16 %v767_v60, %v766_v28  ;;  %v997_v31 = vpack.c.bf16 %v769_v52, %v768_v48  ;;  %v998_v42 = vpack.c.bf16 %v771_v25, %v770_v6  ;;  %v999_v9 = vpack.c.bf16 %v773_v14, %v772_v18 }
 0x153   :  { %876 = vst [vmem:[#allocation2 + $0x98] sm:$0xff] %v988_v2  ;;  %877 = vst [vmem:[#allocation2 + $0xa0] sm:$0xff] %v989_v26 }
 0x154   :  { %878 = vst [vmem:[#allocation2 + $0xa8] sm:$0xff] %v990_v34  ;;  %879 = vst [vmem:[#allocation2 + $0xb0] sm:$0xff] %v991_v20 }
 0x155   :  { %880 = vst [vmem:[#allocation2 + $0xb8] sm:$0xff] %v992_v62  ;;  %881 = vst [vmem:[#allocation2 + $0xc0] sm:$0xff] %v993_v3 }
 0x156   :  { %882 = vst [vmem:[#allocation2 + $0xc8] sm:$0xff] %v994_v17  ;;  %883 = vst [vmem:[#allocation2 + $0xd0] sm:$0xff] %v995_v7 }
 0x157   :  { %884 = vst [vmem:[#allocation2 + $0xd8] sm:$0xff] %v996_v30  ;;  %885 = vst [vmem:[#allocation2 + $0xe0] sm:$0xff] %v997_v31 }
 0x158   :  { %886 = vst [vmem:[#allocation2 + $0xe8] sm:$0xff] %v998_v42  ;;  %887 = vst [vmem:[#allocation2 + $0xf0] sm:$0xff] %v999_v9 }
 0x159   :  { %1034 = shalt.err (!%p1031_p4)
}
 0x15a   :  { %s1035_s12 = scalar_lea.hbm %s1583_s3, 4096 }
 0x15b   :  { %p1036_p5 = scmp.ne.s32.totalorder %s1583_s3, %s1035_s12  ;;  %p1039_p6 = scmp.lt.u32.totalorder %s1035_s12, %s1583_s3 }
 0x15d   :  { %p1041_p7 = pnand %p1039_p6, %p1036_p5 }
 0x15f   :  { %1044 = shalt.err (!%p1041_p7)
}
 0x160   :  { %s1049_s17 = smov 128   ;;  %s1050_s18 = smov 8  }
 0x161   :  { %900 = dma.vmem_to_hbm [thread:$0]  %s1561_s8, 4096, %s1583_s3, [#allocation3], %s1049_s17, %s1049_s17, %s1050_s18  }
 0x162   :  { %1045 = dma.done.wait [#allocation3], 4096  }
 0x163   :  { %1046 = vsyncadd [#allocation3], 4294963200 }
 0x164   :  { %904 = vsyncpa [#allocation3], 1 }

</bundles_post_ra>
